<compile_context>
chip_gen: v5e
topology: v5e:2x2
jax: 0.10.0
libtpu: 0.0.40
codegen_flags: <defaults>
</compile_context>

<pallas_src>
import functools

import jax
import jax.numpy as jnp
from jax.experimental import pallas as pl
from jax.experimental.pallas import tpu as pltpu


def _round_up(x, m):
    return ((x + m - 1) // m) * m


def _sublane_multiple(dtype):
    # Native sublane packing: 32-bit -> 8, 16-bit -> 16, 8-bit -> 32.
    return {4: 8, 2: 16, 1: 32}.get(jnp.dtype(dtype).itemsize, 8)


def _detect_num_tensorcores():
    """Best-effort TensorCores per device: 2 on megacore parts, else 1.

    v5e / v6e have a single TensorCore; defaulting to 1 there removes the extra
    accumulator zero/flush and the clamped 'virtual' tiles that would re-DMA
    the last logits block from HBM for nothing.
    """
    try:
        kind = jax.devices()[0].device_kind.lower()
    except Exception:
        kind = ""
    # Known single-TensorCore generations.
    if any(s in kind for s in ("lite", "v5e", "v6e", "v2", "v3")):
        return 1
    # Megacore-style parts (v4 / v5p / v7x expose 2 TCs per device).
    try:
        info = pltpu.get_tpu_info()
        for name in ("num_tensorcores", "tensorcore_count", "num_cores",
                     "cores_per_chip", "core_count"):
            v = getattr(info, name, None)
            if isinstance(v, int) and v >= 1:
                return min(int(v), 2)
    except Exception:
        pass
    if any(s in kind for s in ("v4", "v5p", "7")):
        return 2
    return 1


def _focal_loss_kernel(logits_ref, target_ref, out_ref, acc_ref, *,
                       gamma, n_rows, tile_n, tiles_per_core):
    core = pl.program_id(0)
    step = pl.program_id(1)

    @pl.when(step == 0)
    def _():
        acc_ref[...] = jnp.zeros_like(acc_ref)

    logits = logits_ref[...].astype(jnp.float32)      # (TILE_N, C)
    tgt = target_ref[...]                             # (TILE_N, 1) int32
    tn, nc = logits.shape

    # Gather output[i, target[i]] via select + row reduce (no one-hot multiply).
    col_ids = jax.lax.broadcasted_iota(jnp.int32, (tn, nc), 1)
    picked = jnp.where(col_ids == tgt, logits, 0.0)
    out_target = jnp.sum(picked, axis=1, keepdims=True)          # (TILE_N, 1)

    # Stable per-row logsumexp; exp(logits - m) computed once.
    m = jnp.max(logits, axis=1, keepdims=True)
    e = jnp.exp(logits - m)
    lse = m + jnp.log(jnp.sum(e, axis=1, keepdims=True))
    ce_loss = lse - out_target                                   # (TILE_N, 1)

    # 1 - sigmoid(x) == sigmoid(-x), computed via exp(-|x|) so no infs are ever
    # generated (one EUP exp + one divide per row).
    z = jnp.exp(-jnp.abs(out_target))
    one_minus_p = jnp.where(out_target >= 0.0, z, 1.0) / (1.0 + z)

    g = float(gamma)
    if g == 0.0:
        focal_weight = jnp.ones_like(one_minus_p)
    elif g.is_integer() and 1.0 <= g <= 4.0:
        focal_weight = one_minus_p
        for _ in range(int(g) - 1):                              # VPU muls, no pow
            focal_weight = focal_weight * one_minus_p
    else:
        focal_weight = jnp.power(one_minus_p, g)

    focal_loss = focal_weight * ce_loss                          # (TILE_N, 1)

    # Mask rows beyond the true batch (block padding / core-balancing tiles).
    # Keep this a SELECT (not a multiply) so garbage / NaN padding rows can
    # never leak into the sums.
    row_ids = jax.lax.broadcasted_iota(jnp.int32, (tn, 1), 0)
    global_rows = (core * tiles_per_core + step) * tile_n + row_ids
    valid = global_rows < n_rows
    sum_fl = jnp.sum(jnp.where(valid, focal_loss, 0.0))
    sum_fw = jnp.sum(jnp.where(valid, focal_weight, 0.0))

    lane = jax.lax.broadcasted_iota(jnp.int32, (1, 2), 1)
    acc_ref[...] += jnp.where(lane == 0, sum_fl, sum_fw)

    @pl.when(step == pl.num_programs(1) - 1)
    def _():
        out_ref[...] = acc_ref[...].reshape(out_ref.shape)


def focal_loss(output, target, gamma=2.0, reduction="mean",
               tile_n=None, num_cores=None, block_budget_bytes=4 << 20):
    """output: [N, C] float; target: [N] int. Returns scalar float32 loss."""
    if reduction not in ("mean", "sum"):
        # TODO(synk): reduction='none' (per-sample vector output) is not wired up.
        raise NotImplementedError("reduction must be 'mean' or 'sum'")

    n, c = output.shape
    itemsize = jnp.dtype(output.dtype).itemsize
    sub = _sublane_multiple(output.dtype)
    target2d = target.astype(jnp.int32).reshape(n, 1)

    # --- Padded (actual) VMEM footprint per block ---
    # logits block: tile_n x round_up(C, 128) x itemsize     (lane padding)
    # target block: tile_n x 128 x 4 B                        (the (tile_n, 1)
    #   int32 column lane-pads to 512 B/row; charged to the budget here.)
    # TODO(synk): a lane-dense (1, tile_n) target layout + in-kernel relayout
    # (and small-C row packing) would cut the target buffer ~128x and raise
    # vector-lane utilization for C<128; kept as a column block for portability.
    lane_c = _round_up(c, 128)
    bytes_per_row = lane_c * itemsize + 128 * 4

    if num_cores is None:
        num_cores = _detect_num_tensorcores()

    if tile_n is None:
        # Largest tile whose *padded* combined footprint fits the per-buffer
        # budget; 512+-row tiles reach ~85% of HBM roofline and amortize the
        # ~0.35 us per-grid-step overhead. Cap to bound per-step latency.
        rows = max(sub, (block_budget_bytes // bytes_per_row) // sub * sub)
        tile_n = int(min(_round_up(n, sub), rows, 8192))
    tile_n = max(sub, (tile_n // sub) * sub)

    # Pad batch so block shapes respect the (8, 128) / sublane-packing layout.
    n_pad = _round_up(n, sub)
    if n_pad != n:
        output = jnp.pad(output, ((0, n_pad - n), (0, 0)))
        target2d = jnp.pad(target2d, ((0, n_pad - n), (0, 0)))

    total_tiles = pl.cdiv(n_pad, tile_n)
    num_cores = int(max(1, min(num_cores, total_tiles)))
    tiles_per_core = pl.cdiv(total_tiles, num_cores)

    def block_index(core, step):
        # Clamp so core-balancing "virtual" tiles re-read the last real block;
        # their rows are masked to zero inside the kernel.
        return (jnp.minimum(core * tiles_per_core + step, total_tiles - 1), 0)

    kernel = functools.partial(
        _focal_loss_kernel,
        gamma=float(gamma), n_rows=n, tile_n=tile_n,
        tiles_per_core=tiles_per_core,
    )

    # Explicit scoped-VMEM budget: double-buffered inputs (padded footprint)
    # + output/accumulator slack; clamped to sit safely inside every
    # generation's physical VMEM (incl. v7x's 64 MiB).
    in_bytes = 2 * tile_n * bytes_per_row
    vmem_limit = int(min(32 << 20, max(16 << 20, in_bytes + (4 << 20))))

    partials = pl.pallas_call(
        kernel,
        out_shape=jax.ShapeDtypeStruct((num_cores, 1, 2), jnp.float32),
        grid_spec=pltpu.PrefetchScalarGridSpec(
            num_scalar_prefetch=0,
            grid=(num_cores, tiles_per_core),
            in_specs=[
                pl.BlockSpec((tile_n, c), block_index),   # logits tile
                pl.BlockSpec((tile_n, 1), block_index),   # target tile
            ],
            out_specs=pl.BlockSpec((1, 1, 2), lambda core, step: (core, 0, 0)),
            scratch_shapes=[pltpu.VMEM((1, 2), jnp.float32)],
        ),
        compiler_params=pltpu.CompilerParams(
            dimension_semantics=("parallel", "arbitrary"),
            vmem_limit_bytes=vmem_limit),
        cost_estimate=pl.CostEstimate(
            flops=8 * n * c,
            transcendentals=n * c + 2 * n,
            bytes_accessed=n_pad * c * itemsize + n_pad * 4 + num_cores * 8),
    )(output, target2d)

    sum_fl = jnp.sum(partials[:, 0, 0])
    sum_fw = jnp.sum(partials[:, 0, 1])
    if reduction == "mean":
        # NOTE: matches the PyTorch module: sum(fl) / sum(fw), NOT mean over N.
        return sum_fl / sum_fw
    return sum_fl


def _focal_loss_ref(output, target, gamma=2.0, reduction="mean"):
    # Pure-JAX reference mirroring the PyTorch module (weight=None).
    out_target = jnp.take_along_axis(output, target[:, None], axis=1)[:, 0]
    probs = jax.nn.sigmoid(out_target)
    focal_weight = (1.0 - probs) ** gamma
    ce = jax.nn.logsumexp(output, axis=1) - out_target
    fl = focal_weight * ce
    if reduction == "mean":
        return jnp.sum(fl / jnp.sum(focal_weight))
    return jnp.sum(fl)


if __name__ == "__main__":
    key = jax.random.PRNGKey(0)
    k1, k2 = jax.random.split(key)

    N, C = 10, 32  # small batch (exercises tail masking: 10 rows padded to 16)
    logits = jax.random.normal(k1, (N, C), dtype=jnp.float32)
    target = jax.random.randint(k2, (N,), 0, C, dtype=jnp.int32)

    loss_mean = jax.block_until_ready(
        focal_loss(logits, target, gamma=2.0, reduction="mean"))
    ref_mean = _focal_loss_ref(logits, target, gamma=2.0, reduction="mean")
    assert jnp.allclose(loss_mean, ref_mean, atol=1e-5, rtol=1e-5), (loss_mean, ref_mean)

    loss_sum = jax.block_until_ready(
        focal_loss(logits, target, gamma=2.0, reduction="sum"))
    ref_sum = _focal_loss_ref(logits, target, gamma=2.0, reduction="sum")
    assert jnp.allclose(loss_sum, ref_sum, atol=1e-5, rtol=1e-5), (loss_sum, ref_sum)

    print("KERNEL_OK")
</pallas_src>

<mosaic_0001>
module attributes {stable_mosaic.version = 11 : i64} {
  func.func @_focal_loss_kernel(%arg0: i32, %arg1: i32, %arg2: memref<16x32xf32, #tpu.memory_space<vmem>>, %arg3: memref<16x1xi32, #tpu.memory_space<vmem>>, %arg4: memref<1x1x2xf32, #tpu.memory_space<vmem>>, %arg5: memref<1x2xf32, #tpu.memory_space<vmem>>) attributes {dimension_semantics = [#tpu.dimension_semantics<parallel>, #tpu.dimension_semantics<arbitrary>], iteration_bounds = array<i64: 1, 1>, scalar_prefetch = 0 : i64, scratch_operands = 1 : i64, tpu.core_type = #tpu.core_type<tc>, window_params = [{transform_indices = @transform_0, window_bounds = array<i64: 16, 32>}, {transform_indices = @transform_1, window_bounds = array<i64: 16, 1>}, {transform_indices = @transform_2, window_bounds = array<i64: 1, 1, 2>}]} {
    %c0_i32 = arith.constant 0 : i32
    %0 = arith.cmpi eq, %arg1, %c0_i32 : i32
    %1 = arith.extui %0 : i1 to i32
    %c0_i32_0 = arith.constant 0 : i32
    %2 = arith.cmpi ne, %1, %c0_i32_0 : i32
    scf.if %2 {
      %cst_22 = arith.constant 0.000000e+00 : f32
      %67 = vector.broadcast %cst_22 : f32 to vector<1x2xf32>
      %c0_23 = arith.constant 0 : index
      %c0_24 = arith.constant 0 : index
      %68 = vector.load %arg5[%c0_23, %c0_24] : memref<1x2xf32, #tpu.memory_space<vmem>>, vector<1x2xf32>
      tpu.vector_store %arg5[%c0_23, %c0_24], %67 {strides = array<i32>} : memref<1x2xf32, #tpu.memory_space<vmem>>, vector<1x2xf32>,
    } else {
    }
    %c0 = arith.constant 0 : index
    %c0_1 = arith.constant 0 : index
    %3 = vector.load %arg2[%c0, %c0_1] : memref<16x32xf32, #tpu.memory_space<vmem>>, vector<16x32xf32>
    %c0_2 = arith.constant 0 : index
    %c0_3 = arith.constant 0 : index
    %4 = vector.load %arg3[%c0_2, %c0_3] : memref<16x1xi32, #tpu.memory_space<vmem>>, vector<16x1xi32>
    %5 = tpu.iota {dimensions = array<i32: 1>} : vector<16x32xi32>
    %6 = vector.broadcast %4 : vector<16x1xi32> to vector<16x32xi32>
    %7 = arith.cmpi eq, %5, %6 : vector<16x32xi32>
    %cst = arith.constant 0.000000e+00 : f32
    %8 = vector.broadcast %cst : f32 to vector<16x32xf32>
    %9 = arith.select %7, %3, %8 : vector<16x32xi1>, vector<16x32xf32>
    %cst_4 = arith.constant dense<0.000000e+00> : vector<16xf32>
    %10 = vector.multi_reduction <add>, %9, %cst_4 [1] : vector<16x32xf32> to vector<16xf32>
    %11 = vector.shape_cast %10 : vector<16xf32> to vector<16x1xf32>
    %cst_5 = arith.constant dense<0xFF800000> : vector<16xf32>
    %12 = vector.multi_reduction <maximumf>, %3, %cst_5 [1] : vector<16x32xf32> to vector<16xf32>
    %13 = vector.shape_cast %12 : vector<16xf32> to vector<16x1xf32>
    %14 = vector.broadcast %13 : vector<16x1xf32> to vector<16x32xf32>
    %15 = arith.subf %3, %14 : vector<16x32xf32>
    %16 = math.exp %15 : vector<16x32xf32>
    %cst_6 = arith.constant dense<0.000000e+00> : vector<16xf32>
    %17 = vector.multi_reduction <add>, %16, %cst_6 [1] : vector<16x32xf32> to vector<16xf32>
    %18 = vector.shape_cast %17 : vector<16xf32> to vector<16x1xf32>
    %19 = math.log %18 : vector<16x1xf32>
    %20 = arith.addf %13, %19 : vector<16x1xf32>
    %21 = arith.subf %20, %11 : vector<16x1xf32>
    %22 = math.absf %11 : vector<16x1xf32>
    %cst_7 = arith.constant 0.000000e+00 : f32
    %23 = vector.broadcast %cst_7 : f32 to vector<16x1xf32>
    %24 = arith.subf %23, %22 : vector<16x1xf32>
    %25 = math.exp %24 : vector<16x1xf32>
    %cst_8 = arith.constant 0.000000e+00 : f32
    %26 = vector.broadcast %cst_8 : f32 to vector<16x1xf32>
    %27 = arith.cmpf oge, %11, %26 : vector<16x1xf32>
    %cst_9 = arith.constant 1.000000e+00 : f32
    %28 = vector.broadcast %cst_9 : f32 to vector<16x1xf32>
    %29 = arith.select %27, %25, %28 : vector<16x1xi1>, vector<16x1xf32>
    %cst_10 = arith.constant 1.000000e+00 : f32
    %30 = vector.broadcast %cst_10 : f32 to vector<16x1xf32>
    %31 = arith.addf %30, %25 : vector<16x1xf32>
    %32 = arith.divf %29, %31 : vector<16x1xf32>
    %33 = arith.mulf %32, %32 : vector<16x1xf32>
    %34 = arith.mulf %33, %21 : vector<16x1xf32>
    %35 = tpu.iota {dimensions = array<i32: 0>} : vector<16x1xi32>
    %c1_i32 = arith.constant 1 : i32
    %36 = arith.muli %arg0, %c1_i32 : i32
    %37 = arith.addi %36, %arg1 : i32
    %c16_i32 = arith.constant 16 : i32
    %38 = arith.muli %37, %c16_i32 : i32
    %39 = vector.broadcast %38 : i32 to vector<16x1xi32>
    %40 = arith.addi %39, %35 : vector<16x1xi32>
    %c10_i32 = arith.constant 10 : i32
    %41 = vector.broadcast %c10_i32 : i32 to vector<16x1xi32>
    %42 = arith.cmpi slt, %40, %41 : vector<16x1xi32>
    %cst_11 = arith.constant 0.000000e+00 : f32
    %43 = vector.broadcast %cst_11 : f32 to vector<16x1xf32>
    %44 = arith.select %42, %34, %43 : vector<16x1xi1>, vector<16x1xf32>
    %45 = vector.shape_cast %44 : vector<16x1xf32> to vector<1x16x1xf32>
    %cst_12 = arith.constant dense<0.000000e+00> : vector<1xf32>
    %46 = vector.multi_reduction <add>, %45, %cst_12 [1, 2] : vector<1x16x1xf32> to vector<1xf32>
    %47 = vector.shape_cast %46 : vector<1xf32> to vector<1x1x1xf32>
    %48 = vector.extract %47[0, 0, 0] : f32 from vector<1x1x1xf32>
    %cst_13 = arith.constant 0.000000e+00 : f32
    %49 = vector.broadcast %cst_13 : f32 to vector<16x1xf32>
    %50 = arith.select %42, %33, %49 : vector<16x1xi1>, vector<16x1xf32>
    %51 = vector.shape_cast %50 : vector<16x1xf32> to vector<1x16x1xf32>
    %cst_14 = arith.constant dense<0.000000e+00> : vector<1xf32>
    %52 = vector.multi_reduction <add>, %51, %cst_14 [1, 2] : vector<1x16x1xf32> to vector<1xf32>
    %53 = vector.shape_cast %52 : vector<1xf32> to vector<1x1x1xf32>
    %54 = vector.extract %53[0, 0, 0] : f32 from vector<1x1x1xf32>
    %55 = tpu.iota {dimensions = array<i32: 1>} : vector<1x2xi32>
    %c0_15 = arith.constant 0 : index
    %c0_16 = arith.constant 0 : index
    %56 = vector.load %arg5[%c0_15, %c0_16] : memref<1x2xf32, #tpu.memory_space<vmem>>, vector<1x2xf32>
    %c0_i32_17 = arith.constant 0 : i32
    %57 = vector.broadcast %c0_i32_17 : i32 to vector<1x2xi32>
    %58 = arith.cmpi eq, %55, %57 : vector<1x2xi32>
    %59 = vector.broadcast %48 : f32 to vector<1x2xf32>
    %60 = vector.broadcast %54 : f32 to vector<1x2xf32>
    %61 = arith.select %58, %59, %60 : vector<1x2xi1>, vector<1x2xf32>
    %62 = arith.addf %56, %61 : vector<1x2xf32>
    %c0_18 = arith.constant 0 : index
    %c0_19 = arith.constant 0 : index
    %63 = vector.load %arg5[%c0_18, %c0_19] : memref<1x2xf32, #tpu.memory_space<vmem>>, vector<1x2xf32>
    tpu.vector_store %arg5[%c0_18, %c0_19], %62 {strides = array<i32>} : memref<1x2xf32, #tpu.memory_space<vmem>>, vector<1x2xf32>,
    %c0_i32_20 = arith.constant 0 : i32
    %64 = arith.cmpi eq, %arg1, %c0_i32_20 : i32
    %65 = arith.extui %64 : i1 to i32
    %c0_i32_21 = arith.constant 0 : i32
    %66 = arith.cmpi ne, %65, %c0_i32_21 : i32
    scf.if %66 {
      %c0_22 = arith.constant 0 : index
      %c0_23 = arith.constant 0 : index
      %67 = vector.load %arg5[%c0_22, %c0_23] : memref<1x2xf32, #tpu.memory_space<vmem>>, vector<1x2xf32>
      %68 = vector.shape_cast %67 : vector<1x2xf32> to vector<1x1x2xf32>
      %c0_24 = arith.constant 0 : index
      %c0_25 = arith.constant 0 : index
      %c0_26 = arith.constant 0 : index
      %69 = vector.load %arg4[%c0_24, %c0_25, %c0_26] : memref<1x1x2xf32, #tpu.memory_space<vmem>>, vector<1x1x2xf32>
      tpu.vector_store %arg4[%c0_24, %c0_25, %c0_26], %68 {strides = array<i32>} : memref<1x1x2xf32, #tpu.memory_space<vmem>>, vector<1x1x2xf32>,
    } else {
    }
    return
  }
  func.func @transform_0(%arg0: i32, %arg1: i32) -> (i32, i32) {
    %c1_i32 = arith.constant 1 : i32
    %0 = arith.muli %arg0, %c1_i32 : i32
    %1 = arith.addi %0, %arg1 : i32
    %c0_i32 = arith.constant 0 : i32
    %2 = arith.minsi %1, %c0_i32 : i32
    %c0_i32_0 = arith.constant 0 : i32
    %c0_i32_1 = arith.constant 0 : i32
    return %2, %c0_i32_0 : i32, i32
  }
  func.func @transform_1(%arg0: i32, %arg1: i32) -> (i32, i32) {
    %c1_i32 = arith.constant 1 : i32
    %0 = arith.muli %arg0, %c1_i32 : i32
    %1 = arith.addi %0, %arg1 : i32
    %c0_i32 = arith.constant 0 : i32
    %2 = arith.minsi %1, %c0_i32 : i32
    %c0_i32_0 = arith.constant 0 : i32
    %c0_i32_1 = arith.constant 0 : i32
    return %2, %c0_i32_0 : i32, i32
  }
  func.func @transform_2(%arg0: i32, %arg1: i32) -> (i32, i32, i32) {
    %c0_i32 = arith.constant 0 : i32
    %c0_i32_0 = arith.constant 0 : i32
    %c0_i32_1 = arith.constant 0 : i32
    return %arg0, %c0_i32, %c0_i32_0 : i32, i32, i32
  }
}

</mosaic_0001>

<bundles_post_ra>
// kernel: tpu_custom_call.1
= control target key start
LH: loop header
LB: loop body
LE: loop exit
PB: predicated region body
PF: predicated region fallthrough
CT: control target
= control target key end

     0   :  { %vm98_vm0 = vcmask 261120   ;;  %v309_v2 = vmov 0   ;;  %s374_s0 = inlined_call_operand.vmem [shape: f32[16,32], index: 0, kind: input, shape index: {}]   ;;  %s375_s1 = inlined_call_operand.vmem [shape: s32[16,1], index: 1, kind: input, shape index: {}]   ;;  %s376_s2 = inlined_call_operand.hbm [shape: f32[1,1,2], index: 2, kind: output, shape index: {}]  }
   0x1   :  { %v85_v0 = vld [vmem:[%s375_s1 + $0x8] sm:$0xff]  ;;  %266 = vset.pattern.permute.xlu0 %v309_v2 }
   0x2   :  { %v83_v1 = vld [vmem:[%s374_s0 + $0x8] sm:$0xff] }
   0x3   :  { %v108_v3 = vsel %vm98_vm0, %v83_v1, -inf }
   0x4   :  { %7 = vsyncpa [#allocation4], 0  ;;  %92 = vperm.xlu0 %266, %v85_v0   ;;  %109 = vmax.xlane.f32.xlu1 %v108_v3  ;;  %v82_v4 = vld [vmem:[%s374_s0] sm:$0xff]  ;;  %v86_v7 = vlaneseq  ;;  %vm191_vm14 = vcmask 7168   ;;  %vm80_vm15 = vcmask 8192   ;;  %s311_s17 = smov [#allocation3]  }
   0x5   :  { %v84_v5 = vld [vmem:[%s375_s1] sm:$0xff]  ;;  %v105_v6 = vsel %vm98_vm0, %v82_v4, -inf  ;;  %s236_s18 = sshll.u32 %s311_s17, 4  ;;  %s238_s21 = sshll.u32 %s376_s2, 4  ;;  %s237_s18 = int_to_ptr.vmem [resolvable:$true] %s236_s18  ;;  %s239_s21 = int_to_ptr.hbm [resolvable:$true] %s238_s21 }
   0x6   :  { %v341_v8 = vand.u32 127, %v86_v7  ;;  %v180_v50 = vshrl.u32 %v86_v7, 7 }
   0x8   :  { %v181_v60 = vadd.s32 8, %v180_v50 }
   0xa   :  { %vm188_vm11 = vcmp.lt.s32.totalorder %v181_v60, 10 }
   0xc   :  { %89 = vperm.xlu0 %266, %v84_v5   ;;  %106 = vmax.xlane.f32.xlu1 %v105_v6 }
  0x76   :  { %v93_v9 = vpop.permute.xlu0 %92 }
  0x77   :  { %vm95_vm1 = vcmp.eq.s32.totalorder %v341_v8, %v93_v9  ;;  %v344_v10 = vpop.xlane.xlu1 %109 }
  0x78   :  { %v112_v11 = vsub.f32 %v83_v1, %v344_v10  ;;  %v97_v12 = vsel %vm95_vm1, %v83_v1, 0.0 }
  0x79   :  { %v102_v13 = vsel %vm98_vm0, %v97_v12, 0.0 }
  0x7a   :  { %v115_v14 = vmul.f32 1.442695, %v112_v11  ;;  %103 = vadd.xlane.f32.xlu2 %v102_v13 }
  0x7c   :  { %267 = vpow2.f32 %v115_v14 }
  0x7e   :  { %v90_v15 = vpop.permute.xlu0 %89 }
  0x7f   :  { %vm94_vm2 = vcmp.eq.s32.totalorder %v341_v8, %v90_v15  ;;  %v349_v16 = vpop.xlane.xlu1 %106 }
  0x80   :  { %v111_v17 = vsub.f32 %v82_v4, %v349_v16  ;;  %v96_v18 = vsel %vm94_vm2, %v82_v4, 0.0 }
  0x81   :  { %v99_v19 = vsel %vm98_vm0, %v96_v18, 0.0 }
  0x82   :  { %v268_v20 = vpop.eup %267  ;;  %v113_v21 = vmul.f32 1.442695, %v111_v17  ;;  %100 = vadd.xlane.f32.xlu2 %v99_v19 }
  0x83   :  { %v120_v22 = vsel %vm98_vm0, %v268_v20, 0.0 }
  0x84   :  { %269 = vpow2.f32 %v113_v21  ;;  %121 = vadd.xlane.f32.xlu0 %v120_v22 }
  0x8a   :  { %v270_v23 = vpop.eup %269 }
  0x8b   :  { %v117_v24 = vsel %vm98_vm0, %v270_v23, 0.0  ;;  %vm219_vm0 = vcmp.eq.s32.totalorder %v341_v8, 0 }
  0x8c   :  { %118 = vadd.xlane.f32.xlu1 %v117_v24 }
  0xed   :  { %v355_v25 = vpop.xlane.xlu2 %103 }
  0xee   :  { %v132_v26 = vand.u32 2147483647, %v355_v25  ;;  %vm140_vm6 = vcmp.ge.f32.partialorder %v355_v25, 0.0 }
  0xf0   :  { %v134_v27 = vsub.f32 0.0, %v132_v26 }
  0xf2   :  { %v137_v28 = vmul.f32 1.442695, %v134_v27 }
  0xf4   :  { %271 = vpow2.f32 %v137_v28 }
  0xf5   :  { %v358_v29 = vpop.xlane.xlu2 %100 }
  0xf6   :  { %v131_v30 = vand.u32 2147483647, %v358_v29  ;;  %vm139_vm12 = vcmp.ge.f32.partialorder %v358_v29, 0.0 }
  0xf7   :  { %v122_v35 = vpop.xlane.xlu0 %121 }
  0xf8   :  { %v133_v31 = vsub.f32 0.0, %v131_v30 }
  0xfa   :  { %v272_v32 = vpop.eup %271  ;;  %v135_v33 = vmul.f32 1.442695, %v133_v31 }
  0xfb   :  { %v144_v34 = vadd.f32 1.0, %v272_v32  ;;  %v142_v54 = vsel %vm140_vm6, %v272_v32, 1.0 }
  0xfc   :  { %273 = vpow2.f32 %v135_v33 }
  0xfd   :  { %275 = vrcp.f32 %v144_v34  ;;  %v171_v42 = vand.u32 2147483648, %v144_v34  ;;  %v169_v45 = vand.u32 2147483647, %v144_v34  ;;  %vm165_vm4 = vweird.f32 %v144_v34 }
  0xfe   :  { %277 = vlog2.f32 %v122_v35 }
  0xff   :  { %v119_v40 = vpop.xlane.xlu1 %118  ;;  %v172_v48 = vor.u32 1.1754944e-38, %v171_v42  ;;  %vm170_vm7 = vcmp.eq.f32.partialorder %v169_v45, 8.507059e+37 }
 0x102   :  { %v274_v36 = vpop.eup %273 }
 0x103   :  { %v276_v37 = vpop.eup %275  ;;  %v143_v38 = vadd.f32 1.0, %v274_v36  ;;  %v141_v6 = vsel %vm139_vm12, %v274_v36, 1.0  ;;  %v310_v36 = vmov 0.0  }
 0x104   :  { %v161_v39 = vmul.f32 %v276_v37, %v144_v34  ;;  %v278_v43 = vpop.eup %277  ;;  %vm166_vm3 = vweird.f32 %v276_v37  ;;  %81 = vst.msk [vmem:[#allocation2] sm:$0x1] %vm80_vm15, %v310_v36 }
 0x105   :  { %279 = vrcp.f32 %v143_v38  ;;  %vm167_vm5 = vmor %vm165_vm4, %vm166_vm3  ;;  %v126_v49 = vmul.f32 0.6931472, %v278_v43  ;;  %v156_v59 = vand.u32 2147483648, %v143_v38  ;;  %v154_v63 = vand.u32 2147483647, %v143_v38 }
 0x106   :  { %v162_v41 = vsub.f32 1.0, %v161_v39  ;;  %281 = vlog2.f32 %v119_v40  ;;  %vm150_vm9 = vweird.f32 %v143_v38 }
 0x107   :  { %v128_v58 = vadd.f32 %v126_v49, %v344_v10  ;;  %v157_v3 = vor.u32 1.1754944e-38, %v156_v59  ;;  %vm155_vm13 = vcmp.eq.f32.partialorder %v154_v63, 8.507059e+37 }
 0x108   :  { %v163_v44 = vmul.f32 %v276_v37, %v162_v41 }
 0x109   :  { %v130_v2 = vsub.f32 %v128_v58, %v355_v25 }
 0x10a   :  { %v164_v46 = vadd.f32 %v276_v37, %v163_v44 }
 0x10b   :  { %v280_v47 = vpop.eup %279 }
 0x10c   :  { %v168_v51 = vsel %vm167_vm5, %v276_v37, %v164_v46  ;;  %v146_v52 = vmul.f32 %v280_v47, %v143_v38  ;;  %v282_v53 = vpop.eup %281  ;;  %vm151_vm8 = vweird.f32 %v280_v47  ;;  %v218_v38 = vld [vmem:[#allocation2] sm:$0x1] }
 0x10d   :  { %v173_v55 = vsel %vm170_vm7, %v172_v48, %v168_v51  ;;  %v124_v61 = vmul.f32 0.6931472, %v282_v53  ;;  %vm152_vm10 = vmor %vm150_vm9, %vm151_vm8 }
 0x10e   :  { %v174_v56 = vmul.f32 %v173_v55, %v142_v54  ;;  %v147_v57 = vsub.f32 1.0, %v146_v52 }
 0x10f   :  { %v127_v4 = vadd.f32 %v124_v61, %v349_v16 }
 0x110   :  { %v148_v62 = vmul.f32 %v280_v47, %v147_v57  ;;  %v176_v0 = vmul.f32 %v174_v56, %v174_v56 }
 0x111   :  { %v129_v12 = vsub.f32 %v127_v4, %v358_v29 }
 0x112   :  { %v149_v1 = vadd.f32 %v280_v47, %v148_v62  ;;  %v178_v9 = vmul.f32 %v176_v0, %v130_v2  ;;  %v205_v11 = vsel %vm188_vm11, %v176_v0, 0.0 }
 0x113   :  { %v207_v17 = vsel %vm191_vm14, %v205_v11, 0.0 }
 0x114   :  { %v153_v5 = vsel %vm152_vm10, %v280_v47, %v149_v1  ;;  %v190_v14 = vsel %vm188_vm11, %v178_v9, 0.0 }
 0x115   :  { %v158_v7 = vsel %vm155_vm13, %v157_v3, %v153_v5  ;;  %v193_v21 = vsel %vm191_vm14, %v190_v14, 0.0 }
 0x116   :  { %v159_v10 = vmul.f32 %v158_v7, %v141_v6 }
 0x118   :  { %v175_v13 = vmul.f32 %v159_v10, %v159_v10 }
 0x11a   :  { %v206_v15 = vsel %vm191_vm14, %v175_v13, 0.0  ;;  %v177_v18 = vmul.f32 %v175_v13, %v129_v12 }
 0x11b   :  { %v208_v19 = vadd.f32 %v207_v17, %v206_v15 }
 0x11c   :  { %v192_v20 = vsel %vm191_vm14, %v177_v18, 0.0 }
 0x11d   :  { %209 = vadd.xlane.f32.xlu1 %v208_v19  ;;  %v194_v16 = vadd.f32 %v193_v21, %v192_v20 }
 0x11f   :  { %195 = vadd.xlane.f32.xlu2 %v194_v16 }
 0x190   :  { %v210_v22 = vpop.xlane.xlu1 %209 }
 0x191   :  { %v211_v23 = vrot.slane %v210_v22, 4 }
 0x192   :  { %v196_v24 = vpop.xlane.xlu2 %195 }
 0x193   :  { %v212_v25 = vadd.f32 %v211_v23, %v210_v22  ;;  %v197_v26 = vrot.slane %v196_v24, 4 }
 0x195   :  { %v213_v27 = vrot.slane %v212_v25, 2  ;;  %v198_v28 = vadd.f32 %v197_v26, %v196_v24 }
 0x197   :  { %v214_v30 = vadd.f32 %v213_v27, %v212_v25  ;;  %v199_v29 = vrot.slane %v198_v28, 2 }
 0x199   :  { %v200_v31 = vadd.f32 %v199_v29, %v198_v28  ;;  %v215_v32 = vrot.slane %v214_v30, 1 }
 0x19b   :  { %v201_v33 = vrot.slane %v200_v31, 1  ;;  %v216_v35 = vadd.f32 %v215_v32, %v214_v30 }
 0x19d   :  { %v202_v34 = vadd.f32 %v201_v33, %v200_v31 }
 0x19f   :  { %259 = vpush %v202_v34 }
 0x1a0   :  { %261 = vpush %v216_v35 }
 0x1d0   :  { %s260_s0 = spop %259 }
 0x1d1   :  { %v220_v37 = vstv %s260_s0  ;;  %s262_s1 = spop %261 }
 0x1d2   :  { %v221_v39 = vstv %s262_s1 }
 0x1d3   :  { %v222_v40 = vsel %vm219_vm0, %v220_v37, %v221_v39 }
 0x1d4   :  { %v223_v41 = vadd.f32 %v222_v40, %v218_v38 }
 0x1d6   :  { %225 = vst.msk [vmem:[#allocation2] sm:$0x1] %vm80_vm15, %v223_v41 }
 0x1dd   :  { %v229_v42 = vld [vmem:[#allocation2] sm:$0x1] }
 0x1de   :  { %230 = vst.msk [vmem:[#allocation3] sm:$0x1] %vm80_vm15, %v229_v42 }
 0x1df   :  { %241 = dma.vmem_to_hbm [thread:$0]  %s237_s18, 16, %s239_s21, [#allocation4]  }
 0x1e0   :  { %307 = dma.done.wait [#allocation4], 16  }
 0x1e1   :  { %308 = vsyncadd [#allocation4], 4294967280 }
 0x1e2   :  { %246 = vsyncpa [#allocation4], 1 }

</bundles_post_ra>
